<compile_context>
chip_gen: v7x
topology: tpu7x:2x2x1
jax: 0.10.0
libtpu: 0.0.40
codegen_flags: <defaults>
</compile_context>

<pallas_src>
import jax
import jax.numpy as jnp
from jax.experimental import pallas as pl
from jax.experimental.pallas import tpu as pltpu


def _conv_kernel(w_ref, b_ref, p_ref, o_ref):
    # w_ref: (Cout, K)      bf16, folded 3x3 weights (K = 9*Cin)
    # b_ref: (Cout, 1)      f32 bias
    # p_ref: (K, TILE_P)    bf16, folded im2col patches (P on the lane axis)
    # o_ref: (Cout, TILE_P) f32, conv + bias + ReLU result
    acc = jnp.dot(w_ref[...], p_ref[...], preferred_element_type=jnp.float32)
    acc = acc + b_ref[...]
    o_ref[...] = jnp.maximum(acc, 0.0).astype(o_ref.dtype)


def _pick_tile(p):
    # Largest lane-aligned tile (multiple of 128) that divides P; tiny layers use P.
    for t in (512, 256, 128):
        if p > t and p % t == 0:
            return t
    return p


def conv3x3_bias_relu(x_nchw, w, b, stride):
    """3x3 conv (pad=1, given stride) + bias + ReLU.

    x_nchw: (N, Cin, H, W), w: (Cout, Cin, 3, 3) [PyTorch layout], b: (Cout,).
    Returns (N, Cout, Ho, Wo).
    """
    N, Cin, H, W = x_nchw.shape
    Cout = w.shape[0]
    Ho = (H + 2 - 3) // stride + 1
    Wo = (W + 2 - 3) // stride + 1
    P = N * Ho * Wo
    K = 9 * Cin

    # --- XLA glue: folded im2col with P on the last (lane) axis ---------------
    xp = jnp.pad(x_nchw, ((0, 0), (0, 0), (1, 1), (1, 1)))
    taps = []
    for dy in range(3):
        for dx in range(3):
            sl = xp[:, :, dy:dy + (Ho - 1) * stride + 1:stride,
                          dx:dx + (Wo - 1) * stride + 1:stride]      # (N, Cin, Ho, Wo)
            taps.append(jnp.transpose(sl, (1, 0, 2, 3)).reshape(Cin, P))
    patches = jnp.concatenate(taps, axis=0).astype(jnp.bfloat16)     # (K, P), K-index = tap*Cin + c

    # Fold weights to match: (Cout, 3, 3, Cin) -> (Cout, 9*Cin) with index tap*Cin + c.
    w_fold = jnp.transpose(w, (0, 2, 3, 1)).reshape(Cout, K).astype(jnp.bfloat16)
    b2 = b.reshape(Cout, 1).astype(jnp.float32)

    # --- Pallas hot path: one big-K matmul per tile of P ----------------------
    tile_p = _pick_tile(P)
    grid = (P // tile_p,)

    out = pl.pallas_call(
        _conv_kernel,
        out_shape=jax.ShapeDtypeStruct((Cout, P), jnp.float32),
        grid=grid,
        in_specs=[
            pl.BlockSpec((Cout, K), lambda i: (0, 0)),        # weights: resident every step
            pl.BlockSpec((Cout, 1), lambda i: (0, 0)),        # bias
            pl.BlockSpec((K, tile_p), lambda i: (0, i)),      # patches tile
        ],
        out_specs=pl.BlockSpec((Cout, tile_p), lambda i: (0, i)),
        compiler_params=pltpu.CompilerParams(
            dimension_semantics=("parallel",),
            vmem_limit_bytes=32 * 1024 * 1024,
        ),
    )(w_fold, b2, patches)

    out = out.reshape(Cout, N, Ho, Wo)
    return jnp.transpose(out, (1, 0, 2, 3))                          # NCHW


def init_params(key):
    # stem: 4->8 (s1), layer1: 8->8 (s1), layer2: 8->16 (s2),
    # layer3: 16->32 (s2), layer4: 32->64 (s2).  PyTorch conv weight layout (Cout,Cin,3,3).
    dims = [('stem', 4, 8), ('layer1', 8, 8), ('layer2', 8, 16),
            ('layer3', 16, 32), ('layer4', 32, 64)]
    params = {}
    for name, cin, cout in dims:
        key, kw, kb = jax.random.split(key, 3)
        params[name + '_w'] = (jax.random.normal(kw, (cout, cin, 3, 3), jnp.float32)
                               * (2.0 / (9 * cin)) ** 0.5)
        params[name + '_b'] = jax.random.normal(kb, (cout,), jnp.float32) * 0.01
    return params


def wrapper_forward(params, x_nchw):
    """Equivalent of Wrapper.forward: run the backbone, return the layer4 hook capture (NCHW)."""
    x = conv3x3_bias_relu(x_nchw, params['stem_w'], params['stem_b'], 1)
    x = conv3x3_bias_relu(x, params['layer1_w'], params['layer1_b'], 1)
    x = conv3x3_bias_relu(x, params['layer2_w'], params['layer2_b'], 2)
    x = conv3x3_bias_relu(x, params['layer3_w'], params['layer3_b'], 2)
    layer4_out = conv3x3_bias_relu(x, params['layer4_w'], params['layer4_b'], 2)
    # TODO(synk): the wrapped backbone would continue with avgpool+fc, but Wrapper
    # discards that result and returns only the layer4 hook capture.
    return layer4_out


if __name__ == "__main__":
    key = jax.random.PRNGKey(0)
    kp, kx = jax.random.split(key)
    params = init_params(kp)
    x = jax.random.normal(kx, (2, 4, 16, 16), jnp.float32)  # NCHW input, like PyTorch

    fwd = jax.jit(wrapper_forward)
    out = fwd(params, x)
    jax.block_until_ready(out)

    assert out.shape == (2, 64, 2, 2), out.shape
    assert out.dtype == jnp.float32
    assert bool(jnp.all(jnp.isfinite(out)))
    print("KERNEL_OK")
</pallas_src>

<mosaic_0001>
module attributes {stable_mosaic.version = 11 : i64} {
  func.func @_conv_kernel(%arg0: i32, %arg1: memref<8x36xbf16, #tpu.memory_space<vmem>>, %arg2: memref<8x1xf32, #tpu.memory_space<vmem>>, %arg3: memref<36x256xbf16, #tpu.memory_space<vmem>>, %arg4: memref<8x256xf32, #tpu.memory_space<vmem>>) attributes {dimension_semantics = [#tpu.dimension_semantics<parallel>], iteration_bounds = array<i64: 2>, scalar_prefetch = 0 : i64, scratch_operands = 0 : i64, tpu.core_type = #tpu.core_type<tc>, window_params = [{pipeline_mode = #tpu.pipeline_mode<synchronous>, transform_indices = @transform_0, window_bounds = array<i64: 8, 36>}, {pipeline_mode = #tpu.pipeline_mode<synchronous>, transform_indices = @transform_1, window_bounds = array<i64: 8, 1>}, {transform_indices = @transform_2, window_bounds = array<i64: 36, 256>}, {transform_indices = @transform_3, window_bounds = array<i64: 8, 256>}]} {
    %c0 = arith.constant 0 : index
    %c0_0 = arith.constant 0 : index
    %0 = vector.load %arg1[%c0, %c0_0] : memref<8x36xbf16, #tpu.memory_space<vmem>>, vector<8x36xbf16>
    %c0_1 = arith.constant 0 : index
    %c0_2 = arith.constant 0 : index
    %1 = vector.load %arg3[%c0_1, %c0_2] : memref<36x256xbf16, #tpu.memory_space<vmem>>, vector<36x256xbf16>
    %cst = arith.constant dense<0.000000e+00> : vector<8x256xf32>
    %2 = tpu.matmul %0, %1, %cst {dimension_numbers = #tpu.dot_dimension_numbers<[1], [0], [0], [1], [0, 0, 1, 1], [], []>} : vector<8x36xbf16>, vector<36x256xbf16>, vector<8x256xf32> -> vector<8x256xf32>
    %c0_3 = arith.constant 0 : index
    %c0_4 = arith.constant 0 : index
    %3 = vector.load %arg2[%c0_3, %c0_4] : memref<8x1xf32, #tpu.memory_space<vmem>>, vector<8x1xf32>
    %4 = vector.broadcast %3 : vector<8x1xf32> to vector<8x256xf32>
    %5 = arith.addf %2, %4 : vector<8x256xf32>
    %cst_5 = arith.constant 0.000000e+00 : f32
    %6 = vector.broadcast %cst_5 : f32 to vector<8x256xf32>
    %7 = arith.maximumf %5, %6 : vector<8x256xf32>
    %c0_6 = arith.constant 0 : index
    %c0_7 = arith.constant 0 : index
    %8 = vector.load %arg4[%c0_6, %c0_7] : memref<8x256xf32, #tpu.memory_space<vmem>>, vector<8x256xf32>
    tpu.vector_store %arg4[%c0_6, %c0_7], %7 {strides = array<i32>} : memref<8x256xf32, #tpu.memory_space<vmem>>, vector<8x256xf32>,
    return
  }
  func.func @transform_0(%arg0: i32) -> (i32, i32) {
    %c0_i32 = arith.constant 0 : i32
    %c0_i32_0 = arith.constant 0 : i32
    %c0_i32_1 = arith.constant 0 : i32
    return %c0_i32, %c0_i32_0 : i32, i32
  }
  func.func @transform_1(%arg0: i32) -> (i32, i32) {
    %c0_i32 = arith.constant 0 : i32
    %c0_i32_0 = arith.constant 0 : i32
    %c0_i32_1 = arith.constant 0 : i32
    return %c0_i32, %c0_i32_0 : i32, i32
  }
  func.func @transform_2(%arg0: i32) -> (i32, i32) {
    %c0_i32 = arith.constant 0 : i32
    %c0_i32_0 = arith.constant 0 : i32
    return %c0_i32, %arg0 : i32, i32
  }
  func.func @transform_3(%arg0: i32) -> (i32, i32) {
    %c0_i32 = arith.constant 0 : i32
    %c0_i32_0 = arith.constant 0 : i32
    return %c0_i32, %arg0 : i32, i32
  }
}

module attributes {stable_mosaic.version = 11 : i64} {
  func.func @_conv_kernel(%arg0: i32, %arg1: memref<8x72xbf16, #tpu.memory_space<vmem>>, %arg2: memref<8x1xf32, #tpu.memory_space<vmem>>, %arg3: memref<72x256xbf16, #tpu.memory_space<vmem>>, %arg4: memref<8x256xf32, #tpu.memory_space<vmem>>) attributes {dimension_semantics = [#tpu.dimension_semantics<parallel>], iteration_bounds = array<i64: 2>, scalar_prefetch = 0 : i64, scratch_operands = 0 : i64, tpu.core_type = #tpu.core_type<tc>, window_params = [{pipeline_mode = #tpu.pipeline_mode<synchronous>, transform_indices = @transform_0, window_bounds = array<i64: 8, 72>}, {pipeline_mode = #tpu.pipeline_mode<synchronous>, transform_indices = @transform_1, window_bounds = array<i64: 8, 1>}, {transform_indices = @transform_2, window_bounds = array<i64: 72, 256>}, {transform_indices = @transform_3, window_bounds = array<i64: 8, 256>}]} {
    %c0 = arith.constant 0 : index
    %c0_0 = arith.constant 0 : index
    %0 = vector.load %arg1[%c0, %c0_0] : memref<8x72xbf16, #tpu.memory_space<vmem>>, vector<8x72xbf16>
    %c0_1 = arith.constant 0 : index
    %c0_2 = arith.constant 0 : index
    %1 = vector.load %arg3[%c0_1, %c0_2] : memref<72x256xbf16, #tpu.memory_space<vmem>>, vector<72x256xbf16>
    %cst = arith.constant dense<0.000000e+00> : vector<8x256xf32>
    %2 = tpu.matmul %0, %1, %cst {dimension_numbers = #tpu.dot_dimension_numbers<[1], [0], [0], [1], [0, 0, 1, 1], [], []>} : vector<8x72xbf16>, vector<72x256xbf16>, vector<8x256xf32> -> vector<8x256xf32>
    %c0_3 = arith.constant 0 : index
    %c0_4 = arith.constant 0 : index
    %3 = vector.load %arg2[%c0_3, %c0_4] : memref<8x1xf32, #tpu.memory_space<vmem>>, vector<8x1xf32>
    %4 = vector.broadcast %3 : vector<8x1xf32> to vector<8x256xf32>
    %5 = arith.addf %2, %4 : vector<8x256xf32>
    %cst_5 = arith.constant 0.000000e+00 : f32
    %6 = vector.broadcast %cst_5 : f32 to vector<8x256xf32>
    %7 = arith.maximumf %5, %6 : vector<8x256xf32>
    %c0_6 = arith.constant 0 : index
    %c0_7 = arith.constant 0 : index
    %8 = vector.load %arg4[%c0_6, %c0_7] : memref<8x256xf32, #tpu.memory_space<vmem>>, vector<8x256xf32>
    tpu.vector_store %arg4[%c0_6, %c0_7], %7 {strides = array<i32>} : memref<8x256xf32, #tpu.memory_space<vmem>>, vector<8x256xf32>,
    return
  }
  func.func @transform_0(%arg0: i32) -> (i32, i32) {
    %c0_i32 = arith.constant 0 : i32
    %c0_i32_0 = arith.constant 0 : i32
    %c0_i32_1 = arith.constant 0 : i32
    return %c0_i32, %c0_i32_0 : i32, i32
  }
  func.func @transform_1(%arg0: i32) -> (i32, i32) {
    %c0_i32 = arith.constant 0 : i32
    %c0_i32_0 = arith.constant 0 : i32
    %c0_i32_1 = arith.constant 0 : i32
    return %c0_i32, %c0_i32_0 : i32, i32
  }
  func.func @transform_2(%arg0: i32) -> (i32, i32) {
    %c0_i32 = arith.constant 0 : i32
    %c0_i32_0 = arith.constant 0 : i32
    return %c0_i32, %arg0 : i32, i32
  }
  func.func @transform_3(%arg0: i32) -> (i32, i32) {
    %c0_i32 = arith.constant 0 : i32
    %c0_i32_0 = arith.constant 0 : i32
    return %c0_i32, %arg0 : i32, i32
  }
}

module attributes {stable_mosaic.version = 11 : i64} {
  func.func @_conv_kernel(%arg0: i32, %arg1: memref<16x72xbf16, #tpu.memory_space<vmem>>, %arg2: memref<16x1xf32, #tpu.memory_space<vmem>>, %arg3: memref<72x128xbf16, #tpu.memory_space<vmem>>, %arg4: memref<16x128xf32, #tpu.memory_space<vmem>>) attributes {dimension_semantics = [#tpu.dimension_semantics<parallel>], iteration_bounds = array<i64: 1>, scalar_prefetch = 0 : i64, scratch_operands = 0 : i64, tpu.core_type = #tpu.core_type<tc>, window_params = [{pipeline_mode = #tpu.pipeline_mode<synchronous>, transform_indices = @transform_0, window_bounds = array<i64: 16, 72>}, {pipeline_mode = #tpu.pipeline_mode<synchronous>, transform_indices = @transform_1, window_bounds = array<i64: 16, 1>}, {transform_indices = @transform_2, window_bounds = array<i64: 72, 128>}, {transform_indices = @transform_3, window_bounds = array<i64: 16, 128>}]} {
    %c0 = arith.constant 0 : index
    %c0_0 = arith.constant 0 : index
    %0 = vector.load %arg1[%c0, %c0_0] : memref<16x72xbf16, #tpu.memory_space<vmem>>, vector<16x72xbf16>
    %c0_1 = arith.constant 0 : index
    %c0_2 = arith.constant 0 : index
    %1 = vector.load %arg3[%c0_1, %c0_2] : memref<72x128xbf16, #tpu.memory_space<vmem>>, vector<72x128xbf16>
    %cst = arith.constant dense<0.000000e+00> : vector<16x128xf32>
    %2 = tpu.matmul %0, %1, %cst {dimension_numbers = #tpu.dot_dimension_numbers<[1], [0], [0], [1], [0, 0, 1, 1], [], []>} : vector<16x72xbf16>, vector<72x128xbf16>, vector<16x128xf32> -> vector<16x128xf32>
    %c0_3 = arith.constant 0 : index
    %c0_4 = arith.constant 0 : index
    %3 = vector.load %arg2[%c0_3, %c0_4] : memref<16x1xf32, #tpu.memory_space<vmem>>, vector<16x1xf32>
    %4 = vector.broadcast %3 : vector<16x1xf32> to vector<16x128xf32>
    %5 = arith.addf %2, %4 : vector<16x128xf32>
    %cst_5 = arith.constant 0.000000e+00 : f32
    %6 = vector.broadcast %cst_5 : f32 to vector<16x128xf32>
    %7 = arith.maximumf %5, %6 : vector<16x128xf32>
    %c0_6 = arith.constant 0 : index
    %c0_7 = arith.constant 0 : index
    %8 = vector.load %arg4[%c0_6, %c0_7] : memref<16x128xf32, #tpu.memory_space<vmem>>, vector<16x128xf32>
    tpu.vector_store %arg4[%c0_6, %c0_7], %7 {strides = array<i32>} : memref<16x128xf32, #tpu.memory_space<vmem>>, vector<16x128xf32>,
    return
  }
  func.func @transform_0(%arg0: i32) -> (i32, i32) {
    %c0_i32 = arith.constant 0 : i32
    %c0_i32_0 = arith.constant 0 : i32
    %c0_i32_1 = arith.constant 0 : i32
    return %c0_i32, %c0_i32_0 : i32, i32
  }
  func.func @transform_1(%arg0: i32) -> (i32, i32) {
    %c0_i32 = arith.constant 0 : i32
    %c0_i32_0 = arith.constant 0 : i32
    %c0_i32_1 = arith.constant 0 : i32
    return %c0_i32, %c0_i32_0 : i32, i32
  }
  func.func @transform_2(%arg0: i32) -> (i32, i32) {
    %c0_i32 = arith.constant 0 : i32
    %c0_i32_0 = arith.constant 0 : i32
    return %c0_i32, %arg0 : i32, i32
  }
  func.func @transform_3(%arg0: i32) -> (i32, i32) {
    %c0_i32 = arith.constant 0 : i32
    %c0_i32_0 = arith.constant 0 : i32
    return %c0_i32, %arg0 : i32, i32
  }
}

module attributes {stable_mosaic.version = 11 : i64} {
  func.func @_conv_kernel(%arg0: i32, %arg1: memref<32x144xbf16, #tpu.memory_space<vmem>>, %arg2: memref<32x1xf32, #tpu.memory_space<vmem>>, %arg3: memref<144x32xbf16, #tpu.memory_space<vmem>>, %arg4: memref<32x32xf32, #tpu.memory_space<vmem>>) attributes {dimension_semantics = [#tpu.dimension_semantics<parallel>], iteration_bounds = array<i64: 1>, scalar_prefetch = 0 : i64, scratch_operands = 0 : i64, tpu.core_type = #tpu.core_type<tc>, window_params = [{pipeline_mode = #tpu.pipeline_mode<synchronous>, transform_indices = @transform_0, window_bounds = array<i64: 32, 144>}, {pipeline_mode = #tpu.pipeline_mode<synchronous>, transform_indices = @transform_1, window_bounds = array<i64: 32, 1>}, {transform_indices = @transform_2, window_bounds = array<i64: 144, 32>}, {transform_indices = @transform_3, window_bounds = array<i64: 32, 32>}]} {
    %c0 = arith.constant 0 : index
    %c0_0 = arith.constant 0 : index
    %0 = vector.load %arg1[%c0, %c0_0] : memref<32x144xbf16, #tpu.memory_space<vmem>>, vector<32x144xbf16>
    %c0_1 = arith.constant 0 : index
    %c0_2 = arith.constant 0 : index
    %1 = vector.load %arg3[%c0_1, %c0_2] : memref<144x32xbf16, #tpu.memory_space<vmem>>, vector<144x32xbf16>
    %cst = arith.constant dense<0.000000e+00> : vector<32x32xf32>
    %2 = tpu.matmul %0, %1, %cst {dimension_numbers = #tpu.dot_dimension_numbers<[1], [0], [0], [1], [0, 0, 1, 1], [], []>} : vector<32x144xbf16>, vector<144x32xbf16>, vector<32x32xf32> -> vector<32x32xf32>
    %c0_3 = arith.constant 0 : index
    %c0_4 = arith.constant 0 : index
    %3 = vector.load %arg2[%c0_3, %c0_4] : memref<32x1xf32, #tpu.memory_space<vmem>>, vector<32x1xf32>
    %4 = vector.broadcast %3 : vector<32x1xf32> to vector<32x32xf32>
    %5 = arith.addf %2, %4 : vector<32x32xf32>
    %cst_5 = arith.constant 0.000000e+00 : f32
    %6 = vector.broadcast %cst_5 : f32 to vector<32x32xf32>
    %7 = arith.maximumf %5, %6 : vector<32x32xf32>
    %c0_6 = arith.constant 0 : index
    %c0_7 = arith.constant 0 : index
    %8 = vector.load %arg4[%c0_6, %c0_7] : memref<32x32xf32, #tpu.memory_space<vmem>>, vector<32x32xf32>
    tpu.vector_store %arg4[%c0_6, %c0_7], %7 {strides = array<i32>} : memref<32x32xf32, #tpu.memory_space<vmem>>, vector<32x32xf32>,
    return
  }
  func.func @transform_0(%arg0: i32) -> (i32, i32) {
    %c0_i32 = arith.constant 0 : i32
    %c0_i32_0 = arith.constant 0 : i32
    %c0_i32_1 = arith.constant 0 : i32
    return %c0_i32, %c0_i32_0 : i32, i32
  }
  func.func @transform_1(%arg0: i32) -> (i32, i32) {
    %c0_i32 = arith.constant 0 : i32
    %c0_i32_0 = arith.constant 0 : i32
    %c0_i32_1 = arith.constant 0 : i32
    return %c0_i32, %c0_i32_0 : i32, i32
  }
  func.func @transform_2(%arg0: i32) -> (i32, i32) {
    %c0_i32 = arith.constant 0 : i32
    %c0_i32_0 = arith.constant 0 : i32
    return %c0_i32, %arg0 : i32, i32
  }
  func.func @transform_3(%arg0: i32) -> (i32, i32) {
    %c0_i32 = arith.constant 0 : i32
    %c0_i32_0 = arith.constant 0 : i32
    return %c0_i32, %arg0 : i32, i32
  }
}

module attributes {stable_mosaic.version = 11 : i64} {
  func.func @_conv_kernel(%arg0: i32, %arg1: memref<64x288xbf16, #tpu.memory_space<vmem>>, %arg2: memref<64x1xf32, #tpu.memory_space<vmem>>, %arg3: memref<288x8xbf16, #tpu.memory_space<vmem>>, %arg4: memref<64x8xf32, #tpu.memory_space<vmem>>) attributes {dimension_semantics = [#tpu.dimension_semantics<parallel>], iteration_bounds = array<i64: 1>, scalar_prefetch = 0 : i64, scratch_operands = 0 : i64, tpu.core_type = #tpu.core_type<tc>, window_params = [{pipeline_mode = #tpu.pipeline_mode<synchronous>, transform_indices = @transform_0, window_bounds = array<i64: 64, 288>}, {pipeline_mode = #tpu.pipeline_mode<synchronous>, transform_indices = @transform_1, window_bounds = array<i64: 64, 1>}, {transform_indices = @transform_2, window_bounds = array<i64: 288, 8>}, {transform_indices = @transform_3, window_bounds = array<i64: 64, 8>}]} {
    %c0 = arith.constant 0 : index
    %c0_0 = arith.constant 0 : index
    %0 = vector.load %arg1[%c0, %c0_0] : memref<64x288xbf16, #tpu.memory_space<vmem>>, vector<64x288xbf16>
    %c0_1 = arith.constant 0 : index
    %c0_2 = arith.constant 0 : index
    %1 = vector.load %arg3[%c0_1, %c0_2] : memref<288x8xbf16, #tpu.memory_space<vmem>>, vector<288x8xbf16>
    %cst = arith.constant dense<0.000000e+00> : vector<64x8xf32>
    %2 = tpu.matmul %0, %1, %cst {dimension_numbers = #tpu.dot_dimension_numbers<[1], [0], [0], [1], [0, 0, 1, 1], [], []>} : vector<64x288xbf16>, vector<288x8xbf16>, vector<64x8xf32> -> vector<64x8xf32>
    %c0_3 = arith.constant 0 : index
    %c0_4 = arith.constant 0 : index
    %3 = vector.load %arg2[%c0_3, %c0_4] : memref<64x1xf32, #tpu.memory_space<vmem>>, vector<64x1xf32>
    %4 = vector.broadcast %3 : vector<64x1xf32> to vector<64x8xf32>
    %5 = arith.addf %2, %4 : vector<64x8xf32>
    %cst_5 = arith.constant 0.000000e+00 : f32
    %6 = vector.broadcast %cst_5 : f32 to vector<64x8xf32>
    %7 = arith.maximumf %5, %6 : vector<64x8xf32>
    %c0_6 = arith.constant 0 : index
    %c0_7 = arith.constant 0 : index
    %8 = vector.load %arg4[%c0_6, %c0_7] : memref<64x8xf32, #tpu.memory_space<vmem>>, vector<64x8xf32>
    tpu.vector_store %arg4[%c0_6, %c0_7], %7 {strides = array<i32>} : memref<64x8xf32, #tpu.memory_space<vmem>>, vector<64x8xf32>,
    return
  }
  func.func @transform_0(%arg0: i32) -> (i32, i32) {
    %c0_i32 = arith.constant 0 : i32
    %c0_i32_0 = arith.constant 0 : i32
    %c0_i32_1 = arith.constant 0 : i32
    return %c0_i32, %c0_i32_0 : i32, i32
  }
  func.func @transform_1(%arg0: i32) -> (i32, i32) {
    %c0_i32 = arith.constant 0 : i32
    %c0_i32_0 = arith.constant 0 : i32
    %c0_i32_1 = arith.constant 0 : i32
    return %c0_i32, %c0_i32_0 : i32, i32
  }
  func.func @transform_2(%arg0: i32) -> (i32, i32) {
    %c0_i32 = arith.constant 0 : i32
    %c0_i32_0 = arith.constant 0 : i32
    return %c0_i32, %arg0 : i32, i32
  }
  func.func @transform_3(%arg0: i32) -> (i32, i32) {
    %c0_i32 = arith.constant 0 : i32
    %c0_i32_0 = arith.constant 0 : i32
    return %c0_i32, %arg0 : i32, i32
  }
}

</mosaic_0001>

<bundles_post_ra>
// kernel: wrapper_forward.5
= control target key start
LH: loop header
LB: loop body
LE: loop exit
PB: predicated region body
PF: predicated region fallthrough
CT: control target
= control target key end

     0   :  { %s481_s12 = smov 0   ;;  %s483_s13 = smov 0   ;;  %s539_s0 = inlined_call_operand.vmem [shape: bf16[8,36], index: 0, kind: input, shape index: {}]   ;;  %s540_s1 = inlined_call_operand.vmem [shape: f32[8,1], index: 1, kind: input, shape index: {}]   ;;  %s541_s2 = inlined_call_operand.vmem [shape: bf16[36,512], index: 2, kind: input, shape index: {}]   ;;  %s542_s3 = inlined_call_operand.vmem [shape: f32[8,512], index: 3, kind: output, shape index: {}]  }
   0x1   :  { %s485_s14 = smov 0  }
   0x2 LB: > { %s380_s15 = sadd.s32 4294967295, %s458_s14   ;;  %s498_s16 = sadd.s32 1, %s458_s14   ;;  %s458_s14 = sphi %s485_s14, %s545_s14   ;;  %s454_s13 = sphi %s483_s13, %s544_s13   ;;  %s450_s12 = sphi %s481_s12, %s543_s12  }
   0x3   : > { %s59_s17 = ssub.s32 %s458_s14, %s498_s16  ;;  %s62_s18 = sadd.s32 1, %s454_s13 }
   0x4   : > { %p60_p0 = scmp.eq.s32.totalorder %s59_s17, 0  ;;  %p69_p1 = scmp.ne.s32.totalorder %s454_s13, %s450_s12 }
   0x5   : > { %p70_p2 = scmp.eq.s32.totalorder %s458_s14, 0  ;;  %p383_p4 = scmp.ge.s32.totalorder %s458_s14, 2 }
   0x6   : > { %s507_s19 = scalar_select %p60_p0, %s454_s13, %s62_s18  }
   0x7   : > { %p71_p3 = por %p70_p2, %p69_p1  ;;  %127 = sbr.rel (%p383_p4) target bundleno = 21 (0x15), region = 24 }
   0xe   : > { %130 = sbr.rel (!%p71_p3) target bundleno = 21 (0x15), region = 28  ;;  %s132_s20 = sand.u32 (%p71_p3), 1, %s454_s13  }
   0xf   : > { %s399_s21 = sshll.u32 (%p71_p3), %s458_s14, 3  ;;  %s400_s22 = smul.u32 (%p71_p3), 40, %s132_s20 }
  0x10   : > { %s137_s25 = scalar_lea.vmem (%p71_p3), %s541_s2, %s399_s21 }
  0x11   : > { %v173_v0 = vld [vmem:[%s137_s25] sm:$0xff] (%p71_p3)  ;;  %v175_v1 = vld [vmem:[%s137_s25 + $0x10] sm:$0xff] (%p71_p3)  ;;  %s134_s26 = scalar_lea.vmem (%p71_p3), [#allocation2], %s400_s22 }
  0x12   : > { %v177_v2 = vld [vmem:[%s137_s25 + $0x20] sm:$0xff] (%p71_p3)  ;;  %v179_v3 = vld [vmem:[%s137_s25 + $0x30] sm:$0xff] (%p71_p3)  ;;  %174 = vst [vmem:[%s134_s26] sm:$0xff] (%p71_p3), %v173_v0  ;;  %176 = vst [vmem:[%s134_s26 + $0x8] sm:$0xff] (%p71_p3), %v175_v1 }
  0x13   : > { %v181_v4 = vld [vmem:[%s137_s25 + $0x40] sm:$0xff] (%p71_p3)  ;;  %178 = vst [vmem:[%s134_s26 + $0x10] sm:$0xff] (%p71_p3), %v177_v2  ;;  %180 = vst [vmem:[%s134_s26 + $0x18] sm:$0xff] (%p71_p3), %v179_v3 }
  0x14   : > { %182 = vst [vmem:[%s134_s26 + $0x20] sm:$0xff] (%p71_p3), %v181_v4 }
  0x15 PF: > { %p386_p5 = scmp.ge.s32.totalorder %s458_s14, 1  ;;  %p187_p6 = scmp.lt.s32.totalorder %s458_s14, 3 }
  0x17   : > { %p188_p7 = pnand %p386_p5, %p187_p6 }
  0x18   : > { %s194_s27 = sand.u32 (!%p188_p7), 1, %s450_s12   ;;  %v460_v5 = vmov (!%p188_p7), 0   ;;  %v231_v6 = vld [vmem:[%s540_s1] sm:$0xff] (!%p188_p7)  ;;  %vm266_vm0 = vcmask (!%p188_p7), 1041408   ;;  %vm262_vm1 = vcmask (!%p188_p7), 293888   ;;  %s387_s7 = sshll.u32 (!%p188_p7), %s380_s15, 1 }
  0x19   : > { %191 = sbr.rel (%p188_p7) target bundleno = 260 (0x104), region = 66  ;;  %305 = vmatprep.mubr.bf16.mxu0 (!%p188_p7), %v460_v5  ;;  %427 = vset.pattern.permute.xlu0 (!%p188_p7), %v460_v5  ;;  %v225_v15 = vld [vmem:[%s539_s0] sm:$0xf] (!%p188_p7)  ;;  %p219_p8 = scmp.lt.s32.totalorder (!%p188_p7), %s387_s7, 3 }
  0x1a   : > { %s401_s28 = smul.u32 (!%p188_p7), 40, %s194_s27  ;;  %234 = vperm.xlu0 (!%p188_p7), %427, %v231_v6  }
  0x1c   : > { %s196_s4 = scalar_lea.vmem (!%p188_p7), [#allocation2], %s401_s28 }
  0x1d   : > { %v428_v7 = vld [vmem:[%s196_s4 + $0x4] ss:$8 sps:$4 sm:$0xff] (!%p188_p7)   ;;  %v430_v8 = vld [vmem:[%s196_s4] ss:$8 sps:$4 sm:$0xff] (!%p188_p7)   ;;  %v431_v9 = vld [vmem:[%s196_s4 + $0x14] ss:$8 sps:$4 sm:$0xff] (!%p188_p7)  }
  0x1e   : > { %273 = vmatprep.subr.bf16.mxu0 (!%p188_p7), %v428_v7  ;;  %v230_v10 = vld [vmem:[%s196_s4 + $0x20] sm:$0x33] (!%p188_p7)  ;;  %v433_v11 = vld [vmem:[%s196_s4 + $0x10] ss:$8 sps:$4 sm:$0xff] (!%p188_p7)  }
  0x1f   : > { %274 = vmatpush1.bf16.msra.mxu0 (!%p188_p7), %v430_v8  ;;  %v394_v12 = vcombine.high (!%p188_p7), %v230_v10, %v230_v10  ;;  %v393_v13 = vcombine.low (!%p188_p7), %v230_v10, %v230_v10 }
  0x20   : > { %275 = vmatprep.subr.bf16.mxu0 %v431_v9  ;;  %s547_s7 = smov (!%p219_p8, %s387_s7), 3 }
  0x21   : > { %v268_v14 = vsel %vm266_vm0, %v393_v13, 0  ;;  %s388_s8 = sshll.u32 %s547_s7, 3 }
  0x22   : > { %s222_s11 = scalar_lea.vmem %s542_s3, %s388_s8 }
  0x23   : > { %276 = vmatpush1.bf16.msra.mxu0 %v433_v11 }
  0x24   : > { %395 = vmatprep.subr.msk.bf16.mxu0 %vm266_vm0, %v394_v12 }
  0x27   : > { %278 = vmatpush1.bf16.msra.mxu0 %v268_v14 }
  0x2a   : > { %396 = vmatmul.mubr.msk.bf16.vlgmr.msra.gmra.mrb[0].mxu0 %vm262_vm1, %v225_v15 }
  0x99   : > { %v235_v16 = vpop.permute.xlu0 %234 }
  0xfd   : > { %v307_v17 = vpop.f32.mrb[0].mxu0 }
  0xfe   : > { %v308_v18 = vadd.f32 %v307_v17, %v235_v16  ;;  %v309_v19 = vpop.f32.mrb[1].mxu0 }
  0xff   : > { %v310_v20 = vadd.f32 %v309_v19, %v235_v16  ;;  %v311_v21 = vpop.f32.mrb[2].mxu0 }
 0x100   : > { %v314_v22 = vmax.f32 %v308_v18, 0.0  ;;  %v312_v23 = vpop.f32.mrb[3].mxu0 }
 0x101   : > { %v315_v24 = vmax.f32 %v310_v20, 0.0 }
 0x102   : > { %316 = vst [vmem:[%s222_s11] sm:$0xff] %v314_v22 }
 0x103   : > { %317 = vst [vmem:[%s222_s11 + $0x8] sm:$0xff] %v315_v24 }
 0x104 PF: > { %p10_p9 = scmp.ge.s32.totalorder %s498_s16, 4   ;;  %s543_s12 = smov %s454_s13 }
 0x105   : > { %s544_s13 = smov %s507_s19  ;;  %s545_s14 = smov %s498_s16 }
 0x106   :  { %12 = sbr.rel (!%p10_p9) target bundleno = 2 (0x2), region = 105 }

// kernel: wrapper_forward.6
= control target key start
LH: loop header
LB: loop body
LE: loop exit
PB: predicated region body
PF: predicated region fallthrough
CT: control target
= control target key end

     0   :  { %s531_s12 = smov 0   ;;  %s533_s13 = smov 0   ;;  %s589_s0 = inlined_call_operand.vmem [shape: bf16[8,72], index: 0, kind: input, shape index: {}]   ;;  %s590_s1 = inlined_call_operand.vmem [shape: f32[8,1], index: 1, kind: input, shape index: {}]   ;;  %s591_s2 = inlined_call_operand.vmem [shape: bf16[72,512], index: 2, kind: input, shape index: {}]   ;;  %s592_s3 = inlined_call_operand.vmem [shape: f32[8,512], index: 3, kind: output, shape index: {}]  }
   0x1   :  { %s535_s14 = smov 0  }
   0x2 LB: > { %s420_s15 = sadd.s32 4294967295, %s508_s14   ;;  %s548_s16 = sadd.s32 1, %s508_s14   ;;  %s508_s14 = sphi %s535_s14, %s595_s14   ;;  %s504_s13 = sphi %s533_s13, %s594_s13   ;;  %s500_s12 = sphi %s531_s12, %s593_s12  }
   0x3   : > { %s59_s17 = ssub.s32 %s508_s14, %s548_s16  ;;  %s62_s18 = sadd.s32 1, %s504_s13 }
   0x4   : > { %p60_p0 = scmp.eq.s32.totalorder %s59_s17, 0  ;;  %p69_p1 = scmp.ne.s32.totalorder %s504_s13, %s500_s12 }
   0x5   : > { %p70_p2 = scmp.eq.s32.totalorder %s508_s14, 0  ;;  %p423_p4 = scmp.ge.s32.totalorder %s508_s14, 2 }
   0x6   : > { %s557_s19 = scalar_select %p60_p0, %s504_s13, %s62_s18  }
   0x7   : > { %p71_p3 = por %p70_p2, %p69_p1  ;;  %127 = sbr.rel (%p423_p4) target bundleno = 23 (0x17), region = 24 }
   0xe   : > { %130 = sbr.rel (!%p71_p3) target bundleno = 23 (0x17), region = 28  ;;  %s132_s20 = sand.u32 (%p71_p3), 1, %s504_s13  }
   0xf   : > { %s443_s21 = sshll.u32 (%p71_p3), %s508_s14, 3  ;;  %s444_s22 = smul.u32 (%p71_p3), 72, %s132_s20 }
  0x10   : > { %s137_s25 = scalar_lea.vmem (%p71_p3), %s591_s2, %s443_s21 }
  0x11   : > { %v181_v0 = vld [vmem:[%s137_s25] sm:$0xff] (%p71_p3)  ;;  %v183_v1 = vld [vmem:[%s137_s25 + $0x10] sm:$0xff] (%p71_p3)  ;;  %s134_s26 = scalar_lea.vmem (%p71_p3), [#allocation2], %s444_s22 }
  0x12   : > { %v185_v2 = vld [vmem:[%s137_s25 + $0x20] sm:$0xff] (%p71_p3)  ;;  %v187_v3 = vld [vmem:[%s137_s25 + $0x30] sm:$0xff] (%p71_p3)  ;;  %182 = vst [vmem:[%s134_s26] sm:$0xff] (%p71_p3), %v181_v0  ;;  %184 = vst [vmem:[%s134_s26 + $0x8] sm:$0xff] (%p71_p3), %v183_v1 }
  0x13   : > { %v189_v4 = vld [vmem:[%s137_s25 + $0x40] sm:$0xff] (%p71_p3)  ;;  %v191_v5 = vld [vmem:[%s137_s25 + $0x50] sm:$0xff] (%p71_p3)  ;;  %186 = vst [vmem:[%s134_s26 + $0x10] sm:$0xff] (%p71_p3), %v185_v2  ;;  %188 = vst [vmem:[%s134_s26 + $0x18] sm:$0xff] (%p71_p3), %v187_v3 }
  0x14   : > { %190 = vst [vmem:[%s134_s26 + $0x20] sm:$0xff] (%p71_p3), %v189_v4  ;;  %192 = vst [vmem:[%s134_s26 + $0x28] sm:$0xff] (%p71_p3), %v191_v5  ;;  %v193_v6 = vld [vmem:[%s137_s25 + $0x60] sm:$0xff] (%p71_p3)  ;;  %v195_v7 = vld [vmem:[%s137_s25 + $0x70] sm:$0xff] (%p71_p3) }
  0x15   : > { %v197_v8 = vld [vmem:[%s137_s25 + $0x80] sm:$0xff]  ;;  %194 = vst [vmem:[%s134_s26 + $0x30] sm:$0xff] %v193_v6  ;;  %196 = vst [vmem:[%s134_s26 + $0x38] sm:$0xff] %v195_v7 }
  0x16   : > { %198 = vst [vmem:[%s134_s26 + $0x40] sm:$0xff] %v197_v8 }
  0x17 PF: > { %p426_p5 = scmp.ge.s32.totalorder %s508_s14, 1  ;;  %p203_p6 = scmp.lt.s32.totalorder %s508_s14, 3 }
  0x19   : > { %p204_p7 = pnand %p426_p5, %p203_p6 }
  0x1a   : > { %s210_s27 = sand.u32 (!%p204_p7), 1, %s500_s12   ;;  %v510_v9 = vmov (!%p204_p7), 0   ;;  %v251_v10 = vld [vmem:[%s590_s1] sm:$0xff] (!%p204_p7)  ;;  %vm306_vm0 = vcmask (!%p204_p7), 1043456   ;;  %vm302_vm1 = vcmask (!%p204_p7), 588800   ;;  %s427_s7 = sshll.u32 (!%p204_p7), %s420_s15, 1 }
  0x1b   : > { %207 = sbr.rel (%p204_p7) target bundleno = 270 (0x10e), region = 66  ;;  %345 = vmatprep.mubr.bf16.mxu0 (!%p204_p7), %v510_v9  ;;  %471 = vset.pattern.permute.xlu0 (!%p204_p7), %v510_v9  ;;  %v241_v23 = vld [vmem:[%s589_s0] sm:$0xf] (!%p204_p7)  ;;  %p235_p8 = scmp.lt.s32.totalorder (!%p204_p7), %s427_s7, 3 }
  0x1c   : > { %s445_s28 = smul.u32 (!%p204_p7), 72, %s210_s27  ;;  %254 = vperm.xlu0 (!%p204_p7), %471, %v251_v10  }
  0x1e   : > { %s212_s4 = scalar_lea.vmem (!%p204_p7), [#allocation2], %s445_s28 }
  0x1f   : > { %v472_v11 = vld [vmem:[%s212_s4 + $0x4] ss:$8 sps:$4 sm:$0xff] (!%p204_p7)   ;;  %v474_v12 = vld [vmem:[%s212_s4] ss:$8 sps:$4 sm:$0xff] (!%p204_p7)   ;;  %v475_v13 = vld [vmem:[%s212_s4 + $0x14] ss:$8 sps:$4 sm:$0xff] (!%p204_p7)  }
  0x20   : > { %313 = vmatprep.subr.bf16.mxu0 (!%p204_p7), %v472_v11  ;;  %v477_v14 = vld [vmem:[%s212_s4 + $0x10] ss:$8 sps:$4 sm:$0xff] (!%p204_p7)   ;;  %v478_v15 = vld [vmem:[%s212_s4 + $0x24] ss:$8 sps:$4 sm:$0xff] (!%p204_p7)   ;;  %v480_v16 = vld [vmem:[%s212_s4 + $0x20] ss:$8 sps:$4 sm:$0xff] (!%p204_p7)  }
  0x21   : > { %314 = vmatpush1.bf16.msra.mxu0 (!%p204_p7), %v474_v12  ;;  %v481_v17 = vld [vmem:[%s212_s4 + $0x34] ss:$8 sps:$4 sm:$0xff] (!%p204_p7)   ;;  %v250_v18 = vld [vmem:[%s212_s4 + $0x40] sm:$0xff] (!%p204_p7)  ;;  %v483_v19 = vld [vmem:[%s212_s4 + $0x30] ss:$8 sps:$4 sm:$0xff] (!%p204_p7)  }
  0x22   : > { %315 = vmatprep.subr.bf16.mxu0 %v475_v13  ;;  %v438_v20 = vcombine.high %v250_v18, %v250_v18  ;;  %v437_v21 = vcombine.low %v250_v18, %v250_v18  ;;  %s597_s7 = smov (!%p235_p8, %s427_s7), 3 }
  0x23   : > { %s428_s8 = sshll.u32 %s597_s7, 3 }
  0x24   : > { %v308_v22 = vsel %vm306_vm0, %v437_v21, 0  ;;  %s238_s11 = scalar_lea.vmem %s592_s3, %s428_s8 }
  0x25   : > { %316 = vmatpush1.bf16.msra.mxu0 %v477_v14 }
  0x26   : > { %317 = vmatprep.subr.bf16.mxu0 %v478_v15 }
  0x29   : > { %318 = vmatpush1.bf16.msra.mxu0 %v480_v16 }
  0x2a   : > { %319 = vmatprep.subr.bf16.mxu0 %v481_v17 }
  0x2d   : > { %320 = vmatpush1.bf16.msra.mxu0 %v483_v19 }
  0x2e   : > { %439 = vmatprep.subr.msk.bf16.mxu0 %vm306_vm0, %v438_v20 }
  0x31   : > { %322 = vmatpush1.bf16.msra.mxu0 %v308_v22 }
  0x34   : > { %440 = vmatmul.mubr.msk.bf16.vlgmr.msra.gmra.mrb[0].mxu0 %vm302_vm1, %v241_v23 }
  0x9b   : > { %v255_v24 = vpop.permute.xlu0 %254 }
 0x107   : > { %v347_v25 = vpop.f32.mrb[0].mxu0 }
 0x108   : > { %v348_v26 = vadd.f32 %v347_v25, %v255_v24  ;;  %v349_v27 = vpop.f32.mrb[1].mxu0 }
 0x109   : > { %v350_v28 = vadd.f32 %v349_v27, %v255_v24  ;;  %v351_v29 = vpop.f32.mrb[2].mxu0 }
 0x10a   : > { %v354_v30 = vmax.f32 %v348_v26, 0.0  ;;  %v352_v31 = vpop.f32.mrb[3].mxu0 }
 0x10b   : > { %v355_v32 = vmax.f32 %v350_v28, 0.0 }
 0x10c   : > { %356 = vst [vmem:[%s238_s11] sm:$0xff] %v354_v30 }
 0x10d   : > { %357 = vst [vmem:[%s238_s11 + $0x8] sm:$0xff] %v355_v32 }
 0x10e PF: > { %p10_p9 = scmp.ge.s32.totalorder %s548_s16, 4   ;;  %s593_s12 = smov %s504_s13 }
 0x10f   : > { %s594_s13 = smov %s557_s19  ;;  %s595_s14 = smov %s548_s16 }
 0x110   :  { %12 = sbr.rel (!%p10_p9) target bundleno = 2 (0x2), region = 105 }

// kernel: wrapper_forward.7
= control target key start
LH: loop header
LB: loop body
LE: loop exit
PB: predicated region body
PF: predicated region fallthrough
CT: control target
= control target key end

     0   :  { %v164_v0 = vmov 0.0   ;;  %vm165_vm0 = vmmov 0   ;;  %v166_v2 = vmov 0   ;;  %vm74_vm1 = vcmask 1043456   ;;  %s217_s2 = inlined_call_operand.vmem [shape: bf16[72,128], index: 2, kind: input, shape index: {}]   ;;  %s218_s1 = inlined_call_operand.vmem [shape: f32[16,1], index: 1, kind: input, shape index: {}]   ;;  %s219_s0 = inlined_call_operand.vmem [shape: bf16[16,72], index: 0, kind: input, shape index: {}]   ;;  %s220_s3 = inlined_call_operand.vmem [shape: f32[16,128], index: 3, kind: output, shape index: {}]  }
   0x1   :  { %140 = vmatprep.subr.bf16.mxu0 %v164_v0  ;;  %v158_v1 = vld [vmem:[%s217_s2] sm:$0xff]   ;;  %150 = vmatprep.mubr.msk.bf16.mxu0 %vm165_vm0, %v164_v0  ;;  %v159_v3 = vld [vmem:[%s217_s2 + $0x8] sm:$0xff]   ;;  %v160_v5 = vld [vmem:[%s217_s2 + $0x10] sm:$0xff]   ;;  %vm70_vm2 = vcmask 588800  }
   0x2   :  { %157 = vset.pattern.permute.xlu0 %v166_v2  ;;  %141 = vmatpush3.bf16.msra.mxu0 %v158_v1  ;;  %v26_v4 = vld [vmem:[%s218_s1] sm:$0xff]  ;;  %v27_v6 = vld [vmem:[%s218_s1 + $0x8] sm:$0xff]  ;;  %v161_v7 = vld [vmem:[%s217_s2 + $0x18] sm:$0xff]  }
   0x3   :  { %142 = vmatprep.subr.bf16.mxu0 %v164_v0  ;;  %30 = vperm.xlu0 %157, %v26_v4   ;;  %v162_v8 = vld [vmem:[%s217_s2 + $0x20] ss:$0 sps:$4 sm:$0xff]  }
   0x4   :  { %v76_v9 = vsel %vm74_vm1, %v162_v8, 0  ;;  %v163_v10 = vld [vmem:[%s219_s0] sm:$0xff]  }
   0x6   :  { %143 = vmatpush3.bf16.msra.mxu0 %v159_v3 }
   0x7   :  { %144 = vmatprep.subr.bf16.mxu0 %v164_v0  ;;  %35 = vperm.xlu0 %157, %v27_v6  }
   0xa   :  { %145 = vmatpush3.bf16.msra.mxu0 %v160_v5 }
   0xb   :  { %146 = vmatprep.subr.bf16.mxu0 %v164_v0 }
   0xe   :  { %147 = vmatpush3.bf16.msra.mxu0 %v161_v7 }
   0xf   :  { %148 = vmatprep.subr.bf16.mxu0 %v164_v0 }
  0x12   :  { %149 = vmatpush3.bf16.msra.mxu0 %v76_v9 }
  0x15   :  { %151 = vmatmul.mubr.msk.bf16.vlgmr.msra.gmra.mrb[0].mxu0 %vm70_vm2, %v163_v10 }
  0x82   :  { %v31_v11 = vpop.permute.xlu0 %30 }
  0x86   :  { %v36_v15 = vpop.permute.xlu0 %35 }
  0xe8   :  { %v112_v12 = vpop.f32.mrb[0].mxu0 }
  0xe9   :  { %v113_v13 = vadd.f32 %v112_v12, %v31_v11  ;;  %v152_v14 = vpop.f32.mrb[1].mxu0 }
  0xea   :  { %v115_v16 = vpop.f32.mrb[2].mxu0 }
  0xeb   :  { %v119_v17 = vmax.f32 %v113_v13, 0.0  ;;  %v116_v18 = vadd.f32 %v115_v16, %v36_v15  ;;  %v153_v19 = vpop.f32.mrb[3].mxu0 }
  0xed   :  { %121 = vst [vmem:[%s220_s3] sm:$0xff] %v119_v17  ;;  %v120_v20 = vmax.f32 %v116_v18, 0.0 }
  0xef   :  { %122 = vst [vmem:[%s220_s3 + $0x8] sm:$0xff] %v120_v20 }

// kernel: wrapper_forward.8
= control target key start
LH: loop header
LB: loop body
LE: loop exit
PB: predicated region body
PF: predicated region fallthrough
CT: control target
= control target key end

     0   :  { %v253_v0 = vmov 0   ;;  %vm133_vm0 = vcmask 130048   ;;  %vm193_vm1 = vcmask 261120   ;;  %s337_s2 = inlined_call_operand.vmem [shape: bf16[144,32], index: 2, kind: input, shape index: {}]   ;;  %s338_s0 = inlined_call_operand.vmem [shape: bf16[32,144], index: 0, kind: input, shape index: {}]   ;;  %s339_s1 = inlined_call_operand.vmem [shape: f32[32,1], index: 1, kind: input, shape index: {}]   ;;  %s340_s3 = inlined_call_operand.vmem [shape: f32[32,32], index: 3, kind: output, shape index: {}]  }
   0x1   :  { %140 = vmatprep.subr.bf16.mxu0 %v253_v0  ;;  %217 = vmatprep.subr.bf16.mxu1 %v253_v0  ;;  %v238_v1 = vld [vmem:[%s337_s2] sm:$0xff]   ;;  %v239_v2 = vld [vmem:[%s337_s2 + $0x8] sm:$0xff]   ;;  %v240_v3 = vld [vmem:[%s337_s2 + $0x10] sm:$0xff]  }
   0x2   :  { %237 = vset.pattern.permute.xlu1 %v253_v0  ;;  %236 = vset.pattern.permute.xlu0 %v253_v0  ;;  %v241_v4 = vld [vmem:[%s337_s2 + $0x18] sm:$0xff]   ;;  %v249_v5 = vld [vmem:[%s338_s0 + $0x4] ss:$8 sps:$4 sm:$0xff]   ;;  %v39_v7 = vld [vmem:[%s339_s1 + $0x10] sm:$0xff] }
   0x3   :  { %141 = vmatpush1.bf16.msra.mxu0 %v238_v1  ;;  %226 = vmatpush1.bf16.msra.mxu1 %v238_v1  ;;  %v252_v6 = vld [vmem:[%s338_s0 + $0x14] ss:$8 sps:$4 sm:$0xff]   ;;  %v37_v8 = vld [vmem:[%s339_s1] sm:$0xff]  ;;  %v38_v11 = vld [vmem:[%s339_s1 + $0x8] sm:$0xff] }
   0x4   :  { %142 = vmatprep.subr.bf16.mxu0 %v253_v0  ;;  %218 = vmatprep.subr.bf16.mxu1 %v253_v0  ;;  %v40_v9 = vld [vmem:[%s339_s1 + $0x18] sm:$0xff]  ;;  %v242_v10 = vld [vmem:[%s337_s2 + $0x20] sm:$0xff]   ;;  %v243_v12 = vld [vmem:[%s337_s2 + $0x28] sm:$0xff]  }
   0x5   :  { %215 = vmatprep.mubr.msk.bf16.mxu0 %vm133_vm0, %v249_v5  ;;  %53 = vperm.xlu1 %237, %v39_v7   ;;  %v244_v13 = vld [vmem:[%s337_s2 + $0x30] sm:$0xff]   ;;  %v245_v14 = vld [vmem:[%s337_s2 + $0x38] sm:$0xff]   ;;  %v246_v15 = vld [vmem:[%s337_s2 + $0x40] sm:$0xff]  }
   0x6   :  { %216 = vmatprep.mubr.msk.bf16.mxu1 %vm133_vm0, %v252_v6  ;;  %43 = vperm.xlu0 %236, %v37_v8   ;;  %v247_v16 = vld [vmem:[%s338_s0] ss:$8 sps:$4 sm:$0xff]   ;;  %v250_v17 = vld [vmem:[%s338_s0 + $0x10] ss:$8 sps:$4 sm:$0xff]  }
   0x7   :  { %143 = vmatpush1.bf16.msra.mxu0 %v239_v2  ;;  %227 = vmatpush1.bf16.msra.mxu1 %v239_v2 }
   0x8   :  { %144 = vmatprep.subr.bf16.mxu0 %v253_v0  ;;  %219 = vmatprep.subr.bf16.mxu1 %v253_v0 }
   0x9   :  { %58 = vperm.xlu1 %237, %v40_v9  }
   0xa   :  { %48 = vperm.xlu0 %236, %v38_v11  }
   0xb   :  { %145 = vmatpush1.bf16.msra.mxu0 %v240_v3  ;;  %228 = vmatpush1.bf16.msra.mxu1 %v240_v3 }
   0xc   :  { %146 = vmatprep.subr.bf16.mxu0 %v253_v0  ;;  %220 = vmatprep.subr.bf16.mxu1 %v253_v0 }
   0xf   :  { %147 = vmatpush1.bf16.msra.mxu0 %v241_v4  ;;  %229 = vmatpush1.bf16.msra.mxu1 %v241_v4 }
  0x10   :  { %148 = vmatprep.subr.bf16.mxu0 %v253_v0  ;;  %221 = vmatprep.subr.bf16.mxu1 %v253_v0 }
  0x13   :  { %149 = vmatpush1.bf16.msra.mxu0 %v242_v10  ;;  %230 = vmatpush1.bf16.msra.mxu1 %v242_v10 }
  0x14   :  { %150 = vmatprep.subr.bf16.mxu0 %v253_v0  ;;  %222 = vmatprep.subr.bf16.mxu1 %v253_v0 }
  0x17   :  { %151 = vmatpush1.bf16.msra.mxu0 %v243_v12  ;;  %231 = vmatpush1.bf16.msra.mxu1 %v243_v12 }
  0x18   :  { %152 = vmatprep.subr.bf16.mxu0 %v253_v0  ;;  %223 = vmatprep.subr.bf16.mxu1 %v253_v0 }
  0x1b   :  { %153 = vmatpush1.bf16.msra.mxu0 %v244_v13  ;;  %232 = vmatpush1.bf16.msra.mxu1 %v244_v13 }
  0x1c   :  { %154 = vmatprep.subr.bf16.mxu0 %v253_v0  ;;  %224 = vmatprep.subr.bf16.mxu1 %v253_v0 }
  0x1f   :  { %155 = vmatpush1.bf16.msra.mxu0 %v245_v14  ;;  %233 = vmatpush1.bf16.msra.mxu1 %v245_v14 }
  0x20   :  { %156 = vmatprep.subr.bf16.mxu0 %v253_v0  ;;  %225 = vmatprep.subr.bf16.mxu1 %v253_v0 }
  0x23   :  { %157 = vmatpush1.bf16.msra.mxu0 %v246_v15  ;;  %234 = vmatpush1.bf16.msra.mxu1 %v246_v15 }
  0x26   :  { %173 = vmatmul.mubr.bf16.vlgmr.msra.gmra.mrb[0].mxu0 %v247_v16  ;;  %181 = vmatmul.mubr.bf16.vlgmr.msra.gmra.mrb[0].mxu1 %v250_v17 }
  0x84   :  { %v54_v18 = vpop.permute.xlu1 %53 }
  0x85   :  { %v44_v19 = vpop.permute.xlu0 %43 }
  0x88   :  { %v59_v20 = vpop.permute.xlu1 %58 }
  0x89   :  { %v49_v21 = vpop.permute.xlu0 %48 }
  0xf9   :  { %v174_v22 = vpop.f32.mrb[0].mxu0  ;;  %v182_v23 = vpop.f32.mrb[0].mxu1 }
  0xfa   :  { %v175_v24 = vadd.f32 %v174_v22, %v44_v19  ;;  %v183_v25 = vadd.f32 %v182_v23, %v54_v18  ;;  %v176_v26 = vpop.f32.mrb[1].mxu0  ;;  %v184_v27 = vpop.f32.mrb[1].mxu1 }
  0xfb   :  { %v177_v28 = vpop.f32.mrb[2].mxu0  ;;  %v185_v29 = vpop.f32.mrb[2].mxu1 }
  0xfc   :  { %v189_v30 = vmax.f32 %v175_v24, 0.0  ;;  %v191_v31 = vmax.f32 %v183_v25, 0.0  ;;  %v178_v32 = vadd.f32 %v177_v28, %v49_v21  ;;  %v186_v33 = vadd.f32 %v185_v29, %v59_v20  ;;  %v179_v34 = vpop.f32.mrb[3].mxu0  ;;  %v187_v35 = vpop.f32.mrb[3].mxu1 }
  0xfe   :  { %194 = vst.msk [vmem:[%s340_s3] sm:$0xff] %vm193_vm1, %v189_v30  ;;  %196 = vst.msk [vmem:[%s340_s3 + $0x10] sm:$0xff] %vm193_vm1, %v191_v31  ;;  %v190_v36 = vmax.f32 %v178_v32, 0.0  ;;  %v192_v37 = vmax.f32 %v186_v33, 0.0 }
 0x100   :  { %195 = vst.msk [vmem:[%s340_s3 + $0x8] sm:$0xff] %vm193_vm1, %v190_v36  ;;  %197 = vst.msk [vmem:[%s340_s3 + $0x18] sm:$0xff] %vm193_vm1, %v192_v37 }

// kernel: wrapper_forward.9
= control target key start
LH: loop header
LB: loop body
LE: loop exit
PB: predicated region body
PF: predicated region fallthrough
CT: control target
= control target key end

     0   :  { %v592_v1 = vmov 0   ;;  %vm283_vm0 = vcmask 261120   ;;  %vm434_vm1 = vcmask 64512   ;;  %s763_s2 = inlined_call_operand.vmem [shape: bf16[288,8], index: 2, kind: input, shape index: {}]   ;;  %s764_s0 = inlined_call_operand.vmem [shape: bf16[64,288], index: 0, kind: input, shape index: {}]   ;;  %s765_s1 = inlined_call_operand.vmem [shape: f32[64,1], index: 1, kind: input, shape index: {}]   ;;  %s766_s3 = inlined_call_operand.vmem [shape: f32[64,8], index: 3, kind: output, shape index: {}]  }
   0x1   :  { %v558_v0 = vld [vmem:[%s763_s2 + $0x40] sm:$0xff]   ;;  %557 = vset.pattern.permute.xlu1 %v592_v1  ;;  %556 = vset.pattern.permute.xlu0 %v592_v1  ;;  %v560_v3 = vld [vmem:[%s763_s2 + $0x48] sm:$0xff]   ;;  %v562_v5 = vld [vmem:[%s763_s2 + $0x50] sm:$0xff]  }
   0x2   :  { %v559_v2 = vld [vmem:[%s763_s2] sm:$0xff]   ;;  %481 = vmatprep.subr.bf16.mxu0 %v558_v0  ;;  %539 = vmatprep.subr.bf16.mxu1 %v558_v0  ;;  %v561_v4 = vld [vmem:[%s763_s2 + $0x8] sm:$0xff]   ;;  %v563_v6 = vld [vmem:[%s763_s2 + $0x10] sm:$0xff]  }
   0x3   :  { %482 = vmatpush3.bf16.msra.mxu0 %v559_v2  ;;  %547 = vmatpush3.bf16.msra.mxu1 %v559_v2  ;;  %v564_v7 = vld [vmem:[%s763_s2 + $0x58] sm:$0xff]   ;;  %v566_v9 = vld [vmem:[%s763_s2 + $0x60] sm:$0xff]   ;;  %v568_v11 = vld [vmem:[%s763_s2 + $0x68] sm:$0xff]  }
   0x4   :  { %483 = vmatprep.subr.bf16.mxu0 %v560_v3  ;;  %540 = vmatprep.subr.bf16.mxu1 %v560_v3  ;;  %v565_v8 = vld [vmem:[%s763_s2 + $0x18] sm:$0xff]   ;;  %v567_v10 = vld [vmem:[%s763_s2 + $0x20] sm:$0xff]   ;;  %v569_v14 = vld [vmem:[%s763_s2 + $0x28] sm:$0xff]  }
   0x5   :  { %v576_v12 = vld [vmem:[%s764_s0 + $0x4] ss:$12 sps:$4 sm:$0xff]   ;;  %v579_v13 = vld [vmem:[%s764_s0 + $0x4c] ss:$12 sps:$4 sm:$0xff]   ;;  %v577_v23 = vld [vmem:[%s764_s0 + $0x48] ss:$12 sps:$4 sm:$0xff]  }
   0x6   :  { %v570_v15 = vld [vmem:[%s763_s2 + $0x70] sm:$0xff]   ;;  %328 = vmatprep.mubr.bf16.mxu0 %v576_v12  ;;  %352 = vmatprep.mubr.bf16.mxu1 %v579_v13  ;;  %v572_v17 = vld [vmem:[%s763_s2 + $0x78] sm:$0xff]   ;;  %v67_v20 = vld [vmem:[%s765_s1] sm:$0xff] }
   0x7   :  { %484 = vmatpush3.bf16.msra.mxu0 %v561_v4  ;;  %548 = vmatpush3.bf16.msra.mxu1 %v561_v4  ;;  %v571_v16 = vld [vmem:[%s763_s2 + $0x30] sm:$0xff]   ;;  %v573_v18 = vld [vmem:[%s763_s2 + $0x38] sm:$0xff]   ;;  %v580_v21 = vld [vmem:[%s763_s2 + $0x80] sm:$0xff]  }
   0x8   :  { %485 = vmatprep.subr.bf16.mxu0 %v562_v5  ;;  %541 = vmatprep.subr.bf16.mxu1 %v562_v5  ;;  %v69_v19 = vld [vmem:[%s765_s1 + $0x10] sm:$0xff]  ;;  %v574_v22 = vld [vmem:[%s764_s0] ss:$12 sps:$4 sm:$0xff]   ;;  %v70_v24 = vld [vmem:[%s765_s1 + $0x18] sm:$0xff] }
   0x9   :  { %87 = vperm.xlu1 %557, %v69_v19   ;;  %77 = vperm.xlu0 %556, %v67_v20   ;;  %v68_v25 = vld [vmem:[%s765_s1 + $0x8] sm:$0xff]  ;;  %v71_v30 = vld [vmem:[%s765_s1 + $0x20] sm:$0xff]  ;;  %v74_v33 = vld [vmem:[%s765_s1 + $0x38] sm:$0xff] }
   0xa   :  { %v582_v26 = vld [vmem:[%s764_s0 + $0x1c] ss:$12 sps:$4 sm:$0xff]   ;;  %v585_v31 = vld [vmem:[%s764_s0 + $0x18] ss:$12 sps:$4 sm:$0xff]   ;;  %v586_v32 = vld [vmem:[%s764_s0 + $0x20] ss:$12 sps:$4 sm:$0xff]  }
   0xb   :  { %486 = vmatpush3.bf16.msra.mxu0 %v563_v6  ;;  %549 = vmatpush3.bf16.msra.mxu1 %v563_v6  ;;  %v581_v27 = vld [vmem:[%s763_s2 + $0x88] sm:$0xff]   ;;  %v73_v34 = vld [vmem:[%s765_s1 + $0x30] sm:$0xff]  ;;  %v589_v36 = vld [vmem:[%s764_s0 + $0x38] ss:$12 sps:$4 sm:$0xff]  }
   0xc   :  { %487 = vmatprep.subr.bf16.mxu0 %v564_v7  ;;  %542 = vmatprep.subr.bf16.mxu1 %v564_v7  ;;  %v584_v28 = vld [vmem:[%s764_s0 + $0x8] ss:$12 sps:$4 sm:$0xff]   ;;  %v590_v37 = vld [vmem:[%s764_s0 + $0x30] ss:$12 sps:$4 sm:$0xff]  }
   0xd   :  { %92 = vperm.xlu1 %557, %v70_v24   ;;  %82 = vperm.xlu0 %556, %v68_v25   ;;  %v72_v29 = vld [vmem:[%s765_s1 + $0x28] sm:$0xff]  ;;  %v587_v35 = vld [vmem:[%s764_s0 + $0x34] ss:$12 sps:$4 sm:$0xff]   ;;  %v591_v38 = vld [vmem:[%s764_s0 + $0x50] ss:$12 sps:$4 sm:$0xff]  }
   0xf   :  { %488 = vmatpush3.bf16.msra.mxu0 %v565_v8  ;;  %550 = vmatpush3.bf16.msra.mxu1 %v565_v8 }
  0x10   :  { %489 = vmatprep.subr.bf16.mxu0 %v566_v9  ;;  %543 = vmatprep.subr.bf16.mxu1 %v566_v9 }
  0x11   :  { %102 = vperm.xlu1 %557, %v72_v29   ;;  %97 = vperm.xlu0 %556, %v71_v30  }
  0x13   :  { %490 = vmatpush3.bf16.msra.mxu0 %v567_v10  ;;  %551 = vmatpush3.bf16.msra.mxu1 %v567_v10 }
  0x14   :  { %491 = vmatprep.subr.bf16.mxu0 %v568_v11  ;;  %544 = vmatprep.subr.bf16.mxu1 %v568_v11 }
  0x15   :  { %112 = vperm.xlu1 %557, %v74_v33   ;;  %107 = vperm.xlu0 %556, %v73_v34  }
  0x17   :  { %492 = vmatpush3.bf16.msra.mxu0 %v569_v14  ;;  %552 = vmatpush3.bf16.msra.mxu1 %v569_v14 }
  0x18   :  { %493 = vmatprep.subr.bf16.mxu0 %v570_v15  ;;  %545 = vmatprep.subr.bf16.mxu1 %v570_v15 }
  0x1b   :  { %494 = vmatpush3.bf16.msra.mxu0 %v571_v16  ;;  %553 = vmatpush3.bf16.msra.mxu1 %v571_v16 }
  0x1c   :  { %495 = vmatprep.subr.bf16.mxu0 %v572_v17  ;;  %546 = vmatprep.subr.bf16.mxu1 %v572_v17 }
  0x1f   :  { %496 = vmatpush3.bf16.msra.mxu0 %v573_v18  ;;  %554 = vmatpush3.bf16.msra.mxu1 %v573_v18 }
  0x20   :  { %527 = vmatprep.subr.bf16.mxu1 %v580_v21 }
  0x22   :  { %329 = vmatmul.mubr.bf16.vlgmr.msra.gmra.mrb[0].mxu0 %v574_v22  ;;  %353 = vmatmul.mubr.bf16.vlgmr.msra.gmra.mrb[0].mxu1 %v577_v23 }
  0x23   :  { %528 = vmatpush3.bf16.msra.mxu1 %v580_v21  ;;  %336 = vmatprep.mubr.bf16.mxu0 %v582_v26 }
  0x24   :  { %529 = vmatprep.subr.bf16.mxu1 %v581_v27  ;;  %531 = vmatprep.mubr.msk.bf16.mxu1 %vm283_vm0, %v584_v28 }
  0x27   :  { %530 = vmatpush3.bf16.msra.mxu1 %v581_v27 }
  0x2a   :  { %337 = vmatmul.mubr.bf16.gmra.mrb[4].mxu0 %v585_v31  ;;  %532 = vmatmul.mubr.msk.bf16.vlgmr.msra.gmra.mrb[4].mxu1 %vm283_vm0, %v586_v32 }
  0x2b   :  { %344 = vmatprep.mubr.bf16.mxu0 %v587_v35  ;;  %535 = vmatprep.mubr.msk.bf16.mxu1 %vm283_vm0, %v589_v36 }
  0x32   :  { %345 = vmatmul.mubr.bf16.gmra.mrb[8].mxu0 %v590_v37  ;;  %536 = vmatmul.mubr.msk.bf16.gmra.mrb[8].mxu1 %vm283_vm0, %v591_v38 }
  0x88   :  { %v88_v39 = vpop.permute.xlu1 %87  ;;  %v78_v40 = vpop.permute.xlu0 %77 }
  0x8c   :  { %v93_v41 = vpop.permute.xlu1 %92  ;;  %v83_v42 = vpop.permute.xlu0 %82 }
  0x90   :  { %v98_v55 = vpop.permute.xlu0 %97  ;;  %v103_v56 = vpop.permute.xlu1 %102 }
  0x94   :  { %v108_v5 = vpop.permute.xlu0 %107  ;;  %v113_v10 = vpop.permute.xlu1 %112 }
  0xf5   :  { %v497_v43 = vpop.f32.mrb[0].mxu0  ;;  %v515_v44 = vpop.f32.mrb[0].mxu1 }
  0xf6   :  { %v498_v45 = vpop.f32.mrb[1].mxu0  ;;  %v516_v46 = vpop.f32.mrb[1].mxu1 }
  0xf7   :  { %v499_v47 = vadd.f32 %v498_v45, %v497_v43  ;;  %v500_v48 = vpop.f32.mrb[2].mxu0  ;;  %v517_v49 = vadd.f32 %v516_v46, %v515_v44  ;;  %v518_v50 = vpop.f32.mrb[2].mxu1 }
  0xf8   :  { %v501_v51 = vpop.f32.mrb[3].mxu0  ;;  %v519_v52 = vpop.f32.mrb[3].mxu1 }
  0xf9   :  { %v502_v53 = vadd.f32 %v501_v51, %v500_v48  ;;  %v520_v54 = vadd.f32 %v519_v52, %v518_v50  ;;  %v331_v59 = vadd.f32 %v499_v47, %v78_v40  ;;  %v355_v14 = vadd.f32 %v517_v49, %v108_v5 }
  0xfb   :  { %v334_v2 = vadd.f32 %v502_v53, %v83_v42  ;;  %v358_v19 = vadd.f32 %v520_v54, %v113_v10 }
  0xfd   :  { %v503_v57 = vpop.f32.mrb[4].mxu0  ;;  %v533_v58 = vpop.f32.mrb[4].mxu1 }
  0xfe   :  { %v504_v60 = vpop.f32.mrb[5].mxu0  ;;  %v395_v61 = vpop.f32.mrb[5].mxu1 }
  0xff   :  { %v505_v62 = vadd.f32 %v504_v60, %v503_v57  ;;  %v396_v63 = vadd.f32 %v395_v61, %v331_v59  ;;  %v506_v0 = vpop.f32.mrb[6].mxu0  ;;  %v534_v1 = vpop.f32.mrb[6].mxu1 }
 0x100   :  { %v507_v3 = vpop.f32.mrb[7].mxu0  ;;  %v398_v4 = vpop.f32.mrb[7].mxu1 }
 0x101   :  { %v339_v6 = vadd.f32 %v505_v62, %v88_v39  ;;  %v426_v7 = vmax.f32 %v396_v63, 0.0  ;;  %v508_v8 = vadd.f32 %v507_v3, %v506_v0  ;;  %v399_v9 = vadd.f32 %v398_v4, %v334_v2 }
 0x103   :  { %v404_v11 = vadd.f32 %v533_v58, %v339_v6  ;;  %435 = vst.msk [vmem:[%s766_s3] sm:$0xff] %vm434_vm1, %v426_v7  ;;  %v342_v12 = vadd.f32 %v508_v8, %v93_v41  ;;  %v427_v13 = vmax.f32 %v399_v9, 0.0 }
 0x105   :  { %v428_v15 = vmax.f32 %v404_v11, 0.0  ;;  %v407_v16 = vadd.f32 %v534_v1, %v342_v12  ;;  %436 = vst.msk [vmem:[%s766_s3 + $0x8] sm:$0xff] %vm434_vm1, %v427_v13  ;;  %v509_v17 = vpop.f32.mrb[8].mxu0  ;;  %v537_v18 = vpop.f32.mrb[8].mxu1 }
 0x106   :  { %v420_v20 = vadd.f32 %v537_v18, %v355_v14  ;;  %v510_v21 = vpop.f32.mrb[9].mxu0  ;;  %v411_v22 = vpop.f32.mrb[9].mxu1 }
 0x107   :  { %437 = vst.msk [vmem:[%s766_s3 + $0x10] sm:$0xff] %vm434_vm1, %v428_v15  ;;  %v429_v23 = vmax.f32 %v407_v16, 0.0  ;;  %v511_v24 = vadd.f32 %v510_v21, %v509_v17  ;;  %v512_v25 = vpop.f32.mrb[10].mxu0  ;;  %v538_v26 = vpop.f32.mrb[10].mxu1 }
 0x108   :  { %v432_v27 = vmax.f32 %v420_v20, 0.0  ;;  %v423_v28 = vadd.f32 %v538_v26, %v358_v19  ;;  %v513_v29 = vpop.f32.mrb[11].mxu0  ;;  %v414_v30 = vpop.f32.mrb[11].mxu1 }
 0x109   :  { %438 = vst.msk [vmem:[%s766_s3 + $0x18] sm:$0xff] %vm434_vm1, %v429_v23  ;;  %v347_v31 = vadd.f32 %v511_v24, %v98_v55  ;;  %v514_v32 = vadd.f32 %v513_v29, %v512_v25 }
 0x10a   :  { %441 = vst.msk [vmem:[%s766_s3 + $0x30] sm:$0xff] %vm434_vm1, %v432_v27  ;;  %v433_v33 = vmax.f32 %v423_v28, 0.0 }
 0x10b   :  { %v412_v34 = vadd.f32 %v411_v22, %v347_v31  ;;  %v350_v35 = vadd.f32 %v514_v32, %v103_v56 }
 0x10c   :  { %442 = vst.msk [vmem:[%s766_s3 + $0x38] sm:$0xff] %vm434_vm1, %v433_v33 }
 0x10d   :  { %v430_v36 = vmax.f32 %v412_v34, 0.0  ;;  %v415_v37 = vadd.f32 %v414_v30, %v350_v35 }
 0x10f   :  { %439 = vst.msk [vmem:[%s766_s3 + $0x20] sm:$0xff] %vm434_vm1, %v430_v36  ;;  %v431_v38 = vmax.f32 %v415_v37, 0.0 }
 0x111   :  { %440 = vst.msk [vmem:[%s766_s3 + $0x28] sm:$0xff] %vm434_vm1, %v431_v38 }

</bundles_post_ra>
